<compile_context>
chip_gen: v7x
topology: tpu7x:2x2x1
jax: 0.10.0
libtpu: 0.0.40
codegen_flags: <defaults>
</compile_context>

<pallas_src>
import functools

import jax
import jax.numpy as jnp
from jax.experimental import pallas as pl
from jax.experimental.pallas import tpu as pltpu

_LANE = 128


def _vmem_budgets():
    """(tile_budget, vmem_limit) scaled to this generation's physical VMEM."""
    try:
        cap = int(pltpu.get_tpu_info().vmem_capacity_bytes)
    except Exception:
        cap = 64 * 1024 * 1024            # conservative fallback (v7x: 64 MiB/TC)
    return (cap * 2) // 5, (cap * 3) // 4  # ~40% for tiles, scoped limit at 75%


def _pick_tile_m(hpwp, batch, k, e, itemsize, tile_budget):
    """Lane-strip width: patches handled per grid step, per image."""
    def fits(tm):
        # double-buffered activation + output strips, plus the (also
        # double-buffered, but tiny) resident weight / bias / gamma / beta.
        need = 2 * tm * (k + e) * itemsize + 2 * (e * k + 3 * e) * itemsize
        return need <= tile_budget

    def strips(tm):
        return -(-hpwp // tm)

    def waste(tm):
        return (strips(tm) * tm - hpwp) / hpwp

    # Whole image (always layout-legal: full last dim) plus lane-aligned strips.
    cands = sorted({hpwp} | {tm for tm in (8192, 4096, 2048, 1024, 512, 256, 128)
                             if tm < hpwp}, reverse=True)
    cands = [tm for tm in cands if fits(tm)]
    if not cands:
        return min(hpwp, _LANE)
    # Prefer the biggest strip that still gives the grid >=4 (then >=2) steps
    # for megacore sharding / pipelining, with <=15% edge-strip waste.
    for min_steps in (4, 2, 1):
        for tm in cands:                       # big -> small
            if batch * strips(tm) >= min_steps and waste(tm) <= 0.15:
                return tm
    return min(cands, key=waste)


def _patch_embed_kernel(x_ref, w_ref, b_ref, *rest, use_norm: bool, eps: float):
    # x_ref: (1, K, TM) patch columns; w_ref: (E, K); b/g/bt refs: (E, 1);
    # o_ref: (1, E, TM).
    if use_norm:
        g_ref, bt_ref, o_ref = rest
    else:
        (o_ref,) = rest

    acc = jnp.dot(w_ref[...], x_ref[0], preferred_element_type=jnp.float32)
    acc = acc + b_ref[...].astype(jnp.float32)            # (E,1) lane-broadcast

    if use_norm:
        # LayerNorm over the embedding (sublane) axis; E is unpadded -> no mask.
        mean = jnp.mean(acc, axis=0, keepdims=True)        # (1, TM)
        centered = acc - mean
        var = jnp.mean(centered * centered, axis=0, keepdims=True)
        acc = centered * jax.lax.rsqrt(var + eps)
        acc = acc * g_ref[...].astype(jnp.float32) + bt_ref[...].astype(jnp.float32)

    o_ref[0] = acc.astype(o_ref.dtype)


def patch_embed_forward(x, weight, bias, gamma=None, beta=None,
                        *, patch_size=4, eps=1e-5):
    """x: (B, C, H, W). weight: (E, C, p, p). bias: (E,).
    gamma/beta: optional (E,) LayerNorm params (norm_layer=nn.LayerNorm).
    Returns (B, E, Hp, Wp) exactly like the PyTorch module."""
    p = patch_size
    B, C, H, W = x.shape
    E = weight.shape[0]
    K = C * p * p

    # F.pad (zero pad right / bottom) so H, W divisible by the patch size.
    pad_h = (-H) % p
    pad_w = (-W) % p
    if pad_h or pad_w:
        x = jnp.pad(x, ((0, 0), (0, 0), (0, pad_h), (0, pad_w)))
    Hp, Wp = (H + pad_h) // p, (W + pad_w) // p
    HpWp = Hp * Wp

    # Patch matrix, K-major per image: (B, C*p*p, Hp*Wp), feature order
    # (c, ph, pw) matches the Conv2d weight flatten order.
    # TODO(synk): fuse this de-interleave into the kernel (needs in-kernel
    # strided-lane gathers / XLU shuffles); it is the one remaining extra
    # input-sized HBM round trip.
    xp = x.reshape(B, C, Hp, p, Wp, p)
    xp = jnp.transpose(xp, (0, 1, 3, 5, 2, 4)).reshape(B, K, HpWp)

    w2 = weight.reshape(E, K)                 # (E, K) — no transpose needed
    b2 = bias.reshape(E, 1)

    itemsize = jnp.dtype(x.dtype).itemsize
    tile_budget, vmem_limit = _vmem_budgets()
    TM = _pick_tile_m(HpWp, B, K, E, itemsize, tile_budget)
    n_strips = pl.cdiv(HpWp, TM)

    use_norm = gamma is not None
    inputs = [xp, w2, b2]
    in_specs = [
        pl.BlockSpec((1, K, TM), lambda b, s: (b, 0, s)),   # full K: no pad
        pl.BlockSpec((E, K), lambda b, s: (0, 0)),          # resident weight
        pl.BlockSpec((E, 1), lambda b, s: (0, 0)),
    ]
    if use_norm:
        inputs += [gamma.reshape(E, 1), beta.reshape(E, 1)]
        in_specs += [pl.BlockSpec((E, 1), lambda b, s: (0, 0)),
                     pl.BlockSpec((E, 1), lambda b, s: (0, 0))]

    kernel = functools.partial(_patch_embed_kernel, use_norm=use_norm, eps=eps)

    cost = pl.CostEstimate(
        flops=2 * B * HpWp * K * E,
        transcendentals=0,
        bytes_accessed=itemsize * (B * K * HpWp + E * K + B * E * HpWp))

    out = pl.pallas_call(
        kernel,
        out_shape=jax.ShapeDtypeStruct((B, E, HpWp), x.dtype),
        grid=(B, n_strips),
        in_specs=in_specs,
        out_specs=pl.BlockSpec((1, E, TM), lambda b, s: (b, 0, s)),
        compiler_params=pltpu.CompilerParams(
            dimension_semantics=("parallel", "parallel"),
            vmem_limit_bytes=vmem_limit),
        cost_estimate=cost,
    )(*inputs)

    return out.reshape(B, E, Hp, Wp)          # already NCHW-flat; reshape is free


def _reference(x, weight, bias, gamma=None, beta=None, *, patch_size=4, eps=1e-5):
    """Pure-JAX reference (same math, HIGHEST precision)."""
    p = patch_size
    B, C, H, W = x.shape
    E = weight.shape[0]
    pad_h = (-H) % p
    pad_w = (-W) % p
    if pad_h or pad_w:
        x = jnp.pad(x, ((0, 0), (0, 0), (0, pad_h), (0, pad_w)))
    Hp, Wp = (H + pad_h) // p, (W + pad_w) // p
    xp = x.reshape(B, C, Hp, p, Wp, p)
    xp = jnp.transpose(xp, (0, 2, 4, 1, 3, 5)).reshape(B * Hp * Wp, C * p * p)
    w2 = weight.reshape(E, -1).T
    y = jnp.dot(xp, w2, precision=jax.lax.Precision.HIGHEST) + bias[None, :]
    if gamma is not None:
        mean = jnp.mean(y, -1, keepdims=True)
        var = jnp.mean((y - mean) ** 2, -1, keepdims=True)
        y = (y - mean) * jax.lax.rsqrt(var + eps) * gamma[None, :] + beta[None, :]
    return jnp.transpose(y.reshape(B, Hp, Wp, E), (0, 3, 1, 2))


if __name__ == "__main__":
    key = jax.random.PRNGKey(0)
    k_x, k_w, k_b, k_g, k_bt = jax.random.split(key, 5)

    B, C, H, W = 2, 4, 16, 16
    patch = 4
    E = 32

    x = jax.random.normal(k_x, (B, C, H, W), dtype=jnp.float32)
    # Conv2d params: weight (E, C, p, p), bias (E,)
    weight = jax.random.normal(k_w, (E, C, patch, patch), dtype=jnp.float32) * 0.05
    bias = jax.random.normal(k_b, (E,), dtype=jnp.float32) * 0.01

    # Default path: norm_layer=None
    out = patch_embed_forward(x, weight, bias, patch_size=patch)
    jax.block_until_ready(out)
    assert out.shape == (B, E, H // patch, W // patch)
    ref = _reference(x, weight, bias, patch_size=patch)
    assert jnp.allclose(out, ref, rtol=1e-2, atol=1e-2), "no-norm path mismatch"

    # Optional path: norm_layer=nn.LayerNorm(embed_dim)
    gamma = jnp.ones((E,), jnp.float32) + 0.1 * jax.random.normal(k_g, (E,))
    beta = 0.1 * jax.random.normal(k_bt, (E,), dtype=jnp.float32)
    out_norm = patch_embed_forward(x, weight, bias, gamma, beta, patch_size=patch)
    jax.block_until_ready(out_norm)
    assert out_norm.shape == (B, E, H // patch, W // patch)
    ref_norm = _reference(x, weight, bias, gamma, beta, patch_size=patch)
    assert jnp.allclose(out_norm, ref_norm, rtol=1e-2, atol=1e-2), "norm path mismatch"

    print("KERNEL_OK")
</pallas_src>

<mosaic_0001>
module attributes {stable_mosaic.version = 11 : i64} {
  func.func @_patch_embed_kernel(%arg0: i32, %arg1: i32, %arg2: memref<1x64x16xf32, #tpu.memory_space<vmem>>, %arg3: memref<32x64xf32, #tpu.memory_space<vmem>>, %arg4: memref<32x1xf32, #tpu.memory_space<vmem>>, %arg5: memref<1x32x16xf32, #tpu.memory_space<vmem>>) attributes {dimension_semantics = [#tpu.dimension_semantics<parallel>, #tpu.dimension_semantics<parallel>], iteration_bounds = array<i64: 2, 1>, scalar_prefetch = 0 : i64, scratch_operands = 0 : i64, tpu.core_type = #tpu.core_type<tc>, window_params = [{transform_indices = @transform_0, window_bounds = array<i64: 1, 64, 16>}, {pipeline_mode = #tpu.pipeline_mode<synchronous>, transform_indices = @transform_1, window_bounds = array<i64: 32, 64>}, {pipeline_mode = #tpu.pipeline_mode<synchronous>, transform_indices = @transform_2, window_bounds = array<i64: 32, 1>}, {transform_indices = @transform_3, window_bounds = array<i64: 1, 32, 16>}]} {
    %c0 = arith.constant 0 : index
    %c0_0 = arith.constant 0 : index
    %0 = vector.load %arg3[%c0, %c0_0] : memref<32x64xf32, #tpu.memory_space<vmem>>, vector<32x64xf32>
    %c0_1 = arith.constant 0 : index
    %c0_2 = arith.constant 0 : index
    %c0_3 = arith.constant 0 : index
    %1 = vector.load %arg2[%c0_1, %c0_2, %c0_3] : memref<1x64x16xf32, #tpu.memory_space<vmem>>, vector<1x64x16xf32>
    %2 = vector.shape_cast %1 : vector<1x64x16xf32> to vector<64x16xf32>
    %cst = arith.constant dense<0.000000e+00> : vector<32x16xf32>
    %3 = tpu.matmul %0, %2, %cst {dimension_numbers = #tpu.dot_dimension_numbers<[1], [0], [0], [1], [0, 0, 1, 1], [], []>} : vector<32x64xf32>, vector<64x16xf32>, vector<32x16xf32> -> vector<32x16xf32>
    %c0_4 = arith.constant 0 : index
    %c0_5 = arith.constant 0 : index
    %4 = vector.load %arg4[%c0_4, %c0_5] : memref<32x1xf32, #tpu.memory_space<vmem>>, vector<32x1xf32>
    %5 = vector.broadcast %4 : vector<32x1xf32> to vector<32x16xf32>
    %6 = arith.addf %3, %5 : vector<32x16xf32>
    %c0_6 = arith.constant 0 : index
    %c0_7 = arith.constant 0 : index
    %c0_8 = arith.constant 0 : index
    %7 = vector.load %arg5[%c0_6, %c0_7, %c0_8] : memref<1x32x16xf32, #tpu.memory_space<vmem>>, vector<1x32x16xf32>
    %8 = vector.shape_cast %7 : vector<1x32x16xf32> to vector<32x16xf32>
    %9 = vector.shape_cast %6 : vector<32x16xf32> to vector<1x32x16xf32>
    tpu.vector_store %arg5[%c0_6, %c0_7, %c0_8], %9 {strides = array<i32>} : memref<1x32x16xf32, #tpu.memory_space<vmem>>, vector<1x32x16xf32>,
    return
  }
  func.func @transform_0(%arg0: i32, %arg1: i32) -> (i32, i32, i32) {
    %c0_i32 = arith.constant 0 : i32
    %c0_i32_0 = arith.constant 0 : i32
    return %arg0, %c0_i32, %arg1 : i32, i32, i32
  }
  func.func @transform_1(%arg0: i32, %arg1: i32) -> (i32, i32) {
    %c0_i32 = arith.constant 0 : i32
    %c0_i32_0 = arith.constant 0 : i32
    %c0_i32_1 = arith.constant 0 : i32
    return %c0_i32, %c0_i32_0 : i32, i32
  }
  func.func @transform_2(%arg0: i32, %arg1: i32) -> (i32, i32) {
    %c0_i32 = arith.constant 0 : i32
    %c0_i32_0 = arith.constant 0 : i32
    %c0_i32_1 = arith.constant 0 : i32
    return %c0_i32, %c0_i32_0 : i32, i32
  }
  func.func @transform_3(%arg0: i32, %arg1: i32) -> (i32, i32, i32) {
    %c0_i32 = arith.constant 0 : i32
    %c0_i32_0 = arith.constant 0 : i32
    return %arg0, %c0_i32, %arg1 : i32, i32, i32
  }
}

</mosaic_0001>

<bundles_post_ra>
// kernel: tpu_custom_call.1
= control target key start
LH: loop header
LB: loop body
LE: loop exit
PB: predicated region body
PF: predicated region fallthrough
CT: control target
= control target key end

     0   :  { %s571_s12 = smov 0   ;;  %s573_s13 = smov 0   ;;  %s636_s0 = inlined_call_operand.vmem [shape: f32[2,64,16], index: 0, kind: input, shape index: {}]   ;;  %s637_s1 = inlined_call_operand.vmem [shape: f32[32,64], index: 1, kind: input, shape index: {}]   ;;  %s638_s2 = inlined_call_operand.vmem [shape: f32[32,1], index: 2, kind: input, shape index: {}]   ;;  %s639_s3 = inlined_call_operand.vmem [shape: f32[2,32,16], index: 3, kind: output, shape index: {}]  }
   0x1   :  { %s575_s14 = smov 0  }
   0x2 LB: > { %s25_s15 = sadd.s32 1, %s544_s13  ;;  %p428_p0 = scmp.ge.s32.totalorder %s548_s14, 1  ;;  %s548_s14 = sphi %s575_s14, %s13_s14   ;;  %s544_s13 = sphi %s573_s13, %s641_s13   ;;  %s540_s12 = sphi %s571_s12, %s640_s12  }
   0x3   : > { %p27_p1 = scmp.ge.s32.totalorder %s25_s15, 2  ;;  %p156_p2 = scmp.lt.s32.totalorder %s548_s14, 3 }
   0x5   : > { %s643_s15 = smov (%p27_p1, %s25_s15), 0  ;;  %p157_p3 = pnand %p428_p0, %p156_p2 }
   0x6   : > { %p186_p4 = scmp.lt.s32.totalorder (!%p157_p3), %s540_s12, 1  ;;  %v202_v0 = vld [vmem:[%s637_s1] sm:$0xff] (!%p157_p3)  ;;  %vm238_vm0 = vcmask (!%p157_p3), 523264   ;;  %v204_v1 = vld [vmem:[%s637_s1 + $0x10] sm:$0xff] (!%p157_p3)  ;;  %v550_v4 = vmov (!%p157_p3), 0   ;;  %v217_v5 = vld [vmem:[%s638_s2 + $0x18] sm:$0xff] (!%p157_p3) }
   0x7   : > { %160 = sbr.rel (%p157_p3) target bundleno = 252 (0xfc), region = 32  ;;  %469 = vmatprep.mubr.msk.f32.mxu0 (!%p157_p3), %vm238_vm0, %v202_v0  ;;  %472 = vmatprep.mubr.msk.f32.mxu1 (!%p157_p3), %vm238_vm0, %v204_v1  ;;  %v216_v2 = vld [vmem:[%s638_s2 + $0x10] sm:$0xff] (!%p157_p3)  ;;  %v214_v3 = vld [vmem:[%s638_s2] sm:$0xff] (!%p157_p3)  ;;  %v215_v6 = vld [vmem:[%s638_s2 + $0x8] sm:$0xff] (!%p157_p3)  ;;  %vm336_vm1 = vcmask (!%p157_p3), 130048  }
   0x8   : > { %525 = vset.pattern.permute.xlu1 (!%p157_p3), %v550_v4  ;;  %524 = vset.pattern.permute.xlu0 (!%p157_p3), %v550_v4  ;;  %v203_v19 = vld [vmem:[%s637_s1 + $0x8] sm:$0xff] (!%p157_p3)  ;;  %v205_v20 = vld [vmem:[%s637_s1 + $0x18] sm:$0xff] (!%p157_p3) }
   0x9   : > { %230 = vperm.xlu1 (!%p157_p3), %525, %v216_v2   ;;  %220 = vperm.xlu0 (!%p157_p3), %524, %v214_v3  }
   0xd   : > { %235 = vperm.xlu1 (!%p157_p3), %525, %v217_v5   ;;  %225 = vperm.xlu0 (!%p157_p3), %524, %v215_v6  }
   0xe   : > { %s645_s12 = smov (!%p186_p4, %s540_s12), 1 }
   0xf   : > { %s439_s24 = sshll.u32 %s645_s12, 6  ;;  %s440_s9 = sshll.u32 %s645_s12, 5 }
  0x10   : > { %s193_s4 = scalar_lea.vmem %s636_s0, %s439_s24  ;;  %s201_s16 = scalar_lea.vmem %s639_s3, %s440_s9 }
  0x11   : > { %v206_v7 = vld [vmem:[%s193_s4] sm:$0xff]  ;;  %v207_v8 = vld [vmem:[%s193_s4 + $0x8] sm:$0xff]  ;;  %v208_v9 = vld [vmem:[%s193_s4 + $0x10] sm:$0xff] }
  0x12   : > { %v475_v10 = vpack.c.bf16 %v207_v8, %v206_v7  ;;  %v209_v11 = vld [vmem:[%s193_s4 + $0x18] sm:$0xff]  ;;  %v210_v13 = vld [vmem:[%s193_s4 + $0x20] sm:$0xff]  ;;  %v211_v14 = vld [vmem:[%s193_s4 + $0x28] sm:$0xff] }
  0x13   : > { %v479_v12 = vpack.c.bf16 %v209_v11, %v208_v9  ;;  %v483_v15 = vpack.c.bf16 %v211_v14, %v210_v13  ;;  %v212_v16 = vld [vmem:[%s193_s4 + $0x30] sm:$0xff]  ;;  %v213_v17 = vld [vmem:[%s193_s4 + $0x38] sm:$0xff] }
  0x14   : > { %476 = vmatprep.subr.bf16.mxu0 %v475_v10  ;;  %491 = vmatprep.subr.bf16.mxu1 %v475_v10  ;;  %v487_v18 = vpack.c.bf16 %v213_v17, %v212_v16 }
  0x15   : > { %478 = vmatpush3.bf16.msra.mxu0 %v475_v10  ;;  %495 = vmatpush3.bf16.msra.mxu1 %v475_v10 }
  0x16   : > { %480 = vmatprep.subr.bf16.mxu0 %v479_v12  ;;  %492 = vmatprep.subr.bf16.mxu1 %v479_v12 }
  0x19   : > { %482 = vmatpush3.bf16.msra.mxu0 %v479_v12  ;;  %496 = vmatpush3.bf16.msra.mxu1 %v479_v12 }
  0x1a   : > { %484 = vmatprep.subr.bf16.mxu0 %v483_v15  ;;  %493 = vmatprep.subr.bf16.mxu1 %v483_v15 }
  0x1d   : > { %486 = vmatpush3.bf16.msra.mxu0 %v483_v15  ;;  %497 = vmatpush3.bf16.msra.mxu1 %v483_v15 }
  0x1e   : > { %488 = vmatprep.subr.bf16.mxu0 %v487_v18  ;;  %494 = vmatprep.subr.bf16.mxu1 %v487_v18 }
  0x21   : > { %490 = vmatpush3.bf16.msra.mxu0 %v487_v18  ;;  %498 = vmatpush3.bf16.msra.mxu1 %v487_v18 }
  0x24   : > { %470 = vmatmul.mubr.msk.f32.vlgmr.msra.gmra.mrb[0].mxu0 %vm238_vm0, %v203_v19  ;;  %473 = vmatmul.mubr.msk.f32.vlgmr.msra.gmra.mrb[0].mxu1 %vm238_vm0, %v205_v20 }
  0x88   : > { %v231_v21 = vpop.permute.xlu1 %230  ;;  %v221_v22 = vpop.permute.xlu0 %220 }
  0x8c   : > { %v236_v23 = vpop.permute.xlu1 %235  ;;  %v226_v24 = vpop.permute.xlu0 %225 }
  0xf7   : > { %v471_v25 = vpop.f32.mrb[0].mxu0  ;;  %v474_v26 = vpop.f32.mrb[0].mxu1 }
  0xf8   : > { %v323_v27 = vadd.f32 %v471_v25, %v226_v24  ;;  %v333_v28 = vadd.f32 %v474_v26, %v236_v23  ;;  %v317_v29 = vpop.f32.mrb[1].mxu0  ;;  %v327_v30 = vpop.f32.mrb[1].mxu1 }
  0xf9   : > { %v318_v31 = vadd.f32 %v317_v29, %v221_v22  ;;  %v328_v32 = vadd.f32 %v327_v30, %v231_v21 }
  0xfa   : > { %338 = vst.msk [vmem:[%s201_s16 + $0x8] sm:$0xff] %vm336_vm1, %v323_v27  ;;  %340 = vst.msk [vmem:[%s201_s16 + $0x18] sm:$0xff] %vm336_vm1, %v333_v28 }
  0xfb   : > { %337 = vst.msk [vmem:[%s201_s16] sm:$0xff] %vm336_vm1, %v318_v31  ;;  %339 = vst.msk [vmem:[%s201_s16 + $0x10] sm:$0xff] %vm336_vm1, %v328_v32 }
  0xfc PF: > { %s13_s14 = sadd.s32 1, %s548_s14   ;;  %s640_s12 = smov %s544_s13 }
  0xfd   : > { %p10_p5 = scmp.ge.s32.totalorder %s13_s14, 4   ;;  %s641_s13 = smov %s643_s15 }
  0xff   :  { %12 = sbr.rel (!%p10_p5) target bundleno = 2 (0x2), region = 62 }

</bundles_post_ra>
